<compile_context>
chip_gen: v7x
topology: tpu7x:2x2x1
jax: 0.10.0
libtpu: 0.0.40
codegen_flags: <defaults>
</compile_context>

<pallas_src>
import math
import functools

import jax
import jax.numpy as jnp
from jax.experimental import pallas as pl
from jax.experimental.pallas import tpu as pltpu


# ----------------------------------------------------------------------------
# Kernels
# ----------------------------------------------------------------------------
def _mm_kernel(a_ref, b_ref, o_ref, acc_ref):
    """o = a @ b, tiled over (M, N, K) with K innermost (accumulator pattern)."""
    k = pl.program_id(2)

    @pl.when(k == 0)
    def _():
        acc_ref[...] = jnp.zeros_like(acc_ref)

    acc_ref[...] += jnp.dot(a_ref[...], b_ref[...],
                            preferred_element_type=jnp.float32)

    @pl.when(k == pl.num_programs(2) - 1)
    def _():
        o_ref[...] = acc_ref[...].astype(o_ref.dtype)


def _mm_bias_epilogue_kernel(a_ref, b_ref, bias_ref, o_ref, acc_ref, *, relu):
    """o = (a @ b) + bias, optional ReLU, fused into the last-K store."""
    k = pl.program_id(2)

    @pl.when(k == 0)
    def _():
        acc_ref[...] = jnp.zeros_like(acc_ref)

    acc_ref[...] += jnp.dot(a_ref[...], b_ref[...],
                            preferred_element_type=jnp.float32)

    @pl.when(k == pl.num_programs(2) - 1)
    def _():
        h = acc_ref[...] + bias_ref[...]          # bias is (1, tn), broadcasts
        if relu:
            h = jnp.maximum(h, 0.0)
        o_ref[...] = h.astype(o_ref.dtype)


# ----------------------------------------------------------------------------
# Tiled matmul wrapper
# ----------------------------------------------------------------------------
def _tiled_matmul(a, b, bias=None, relu=False, *, tm=256, tn=256, tk=512):
    M, K = a.shape
    K2, N = b.shape
    assert K == K2, "inner dims must match"

    tm = M if M <= tm else tm
    tn = N if N <= tn else tn
    tk = K if K <= tk else tk
    # Demo-sized shapes always divide; real deployments should pick divisor tiles.
    assert M % tm == 0 and N % tn == 0 and K % tk == 0, "dims must divide tiles"

    grid = (M // tm, N // tn, K // tk)

    a_spec = pl.BlockSpec((tm, tk), lambda i, j, k: (i, k))
    b_spec = pl.BlockSpec((tk, tn), lambda i, j, k: (k, j))
    o_spec = pl.BlockSpec((tm, tn), lambda i, j, k: (i, j))

    if bias is None:
        kernel = _mm_kernel
        in_specs = [a_spec, b_spec]
        operands = (a, b)
    else:
        kernel = functools.partial(_mm_bias_epilogue_kernel, relu=relu)
        bias_spec = pl.BlockSpec((1, tn), lambda i, j, k: (0, j))
        in_specs = [a_spec, b_spec, bias_spec]
        operands = (a, b, bias)

    return pl.pallas_call(
        kernel,
        out_shape=jax.ShapeDtypeStruct((M, N), a.dtype),
        grid_spec=pltpu.PrefetchScalarGridSpec(
            num_scalar_prefetch=0,
            grid=grid,
            in_specs=in_specs,
            out_specs=o_spec,
            scratch_shapes=[pltpu.VMEM((tm, tn), jnp.float32)],
        ),
        compiler_params=pltpu.CompilerParams(
            dimension_semantics=("parallel", "parallel", "arbitrary")),
    )(*operands)


# ----------------------------------------------------------------------------
# LayerGCN forward
# ----------------------------------------------------------------------------
def layer_gcn(x, adj, params):
    """Faithful eval-mode forward of LayerGCN (dropout == identity)."""
    # GraphConvolution 1: relu(adj @ (x @ W1) + b1)
    support1 = _tiled_matmul(x, params["w1"])
    h1 = _tiled_matmul(adj, support1, bias=params["b1"], relu=True)
    # TODO(synk): F.dropout in training mode not implemented (identity at inference).

    # GraphConvolution 2: relu(adj @ (h1 @ W2) + b2)
    support2 = _tiled_matmul(h1, params["w2"])
    h2 = _tiled_matmul(adj, support2, bias=params["b2"], relu=True)
    return h2


def init_params(key, nfeat, nhid, nclass):
    """Matches GraphConvolution.reset_parameters: uniform(-1/sqrt(out), 1/sqrt(out))."""
    k1, k2, k3, k4 = jax.random.split(key, 4)
    stdv1 = 1.0 / math.sqrt(nhid)
    stdv2 = 1.0 / math.sqrt(nclass)
    return {
        "w1": jax.random.uniform(k1, (nfeat, nhid), jnp.float32, -stdv1, stdv1),
        "b1": jax.random.uniform(k2, (1, nhid), jnp.float32, -stdv1, stdv1),
        "w2": jax.random.uniform(k3, (nhid, nclass), jnp.float32, -stdv2, stdv2),
        "b2": jax.random.uniform(k4, (1, nclass), jnp.float32, -stdv2, stdv2),
    }


if __name__ == "__main__":
    N, NFEAT, NHID, NCLASS = 16, 32, 32, 16

    key = jax.random.PRNGKey(0)
    kx, ka, kp = jax.random.split(key, 3)

    # node features
    x = jax.random.normal(kx, (N, NFEAT), jnp.float32)

    # symmetric, self-looped, row-normalized adjacency
    a = (jax.random.uniform(ka, (N, N)) < 0.3).astype(jnp.float32)
    a = jnp.maximum(a, a.T)
    a = jnp.maximum(a, jnp.eye(N, dtype=jnp.float32))
    adj = a / jnp.sum(a, axis=1, keepdims=True)

    params = init_params(kp, NFEAT, NHID, NCLASS)

    out = layer_gcn(x, adj, params)
    jax.block_until_ready(out)

    # pure-JAX reference mirroring the PyTorch forward (eval mode)
    hp = jax.lax.Precision.HIGHEST
    ref = jnp.maximum(
        jnp.dot(adj, jnp.dot(x, params["w1"], precision=hp), precision=hp)
        + params["b1"], 0.0)
    ref = jnp.maximum(
        jnp.dot(adj, jnp.dot(ref, params["w2"], precision=hp), precision=hp)
        + params["b2"], 0.0)

    assert out.shape == (N, NCLASS)
    assert bool(jnp.allclose(out, ref, rtol=2e-2, atol=2e-2)), (
        "max abs err = %f" % float(jnp.max(jnp.abs(out - ref))))
    print("KERNEL_OK")
</pallas_src>

<mosaic_0001>
module attributes {stable_mosaic.version = 11 : i64} {
  func.func @_mm_kernel(%arg0: i32, %arg1: i32, %arg2: i32, %arg3: memref<16x32xf32, #tpu.memory_space<vmem>>, %arg4: memref<32x32xf32, #tpu.memory_space<vmem>>, %arg5: memref<16x32xf32, #tpu.memory_space<vmem>>, %arg6: memref<16x32xf32, #tpu.memory_space<vmem>>) attributes {dimension_semantics = [#tpu.dimension_semantics<parallel>, #tpu.dimension_semantics<parallel>, #tpu.dimension_semantics<arbitrary>], iteration_bounds = array<i64: 1, 1, 1>, scalar_prefetch = 0 : i64, scratch_operands = 1 : i64, tpu.core_type = #tpu.core_type<tc>, window_params = [{transform_indices = @transform_0, window_bounds = array<i64: 16, 32>}, {transform_indices = @transform_1, window_bounds = array<i64: 32, 32>}, {transform_indices = @transform_2, window_bounds = array<i64: 16, 32>}]} {
    %c0_i32 = arith.constant 0 : i32
    %0 = arith.cmpi eq, %arg2, %c0_i32 : i32
    %1 = arith.extui %0 : i1 to i32
    %c0_i32_0 = arith.constant 0 : i32
    %2 = arith.cmpi ne, %1, %c0_i32_0 : i32
    scf.if %2 {
      %cst_10 = arith.constant 0.000000e+00 : f32
      %12 = vector.broadcast %cst_10 : f32 to vector<16x32xf32>
      %c0_11 = arith.constant 0 : index
      %c0_12 = arith.constant 0 : index
      %13 = vector.load %arg6[%c0_11, %c0_12] : memref<16x32xf32, #tpu.memory_space<vmem>>, vector<16x32xf32>
      tpu.vector_store %arg6[%c0_11, %c0_12], %12 {strides = array<i32>} : memref<16x32xf32, #tpu.memory_space<vmem>>, vector<16x32xf32>,
    } else {
    }
    %c0 = arith.constant 0 : index
    %c0_1 = arith.constant 0 : index
    %3 = vector.load %arg6[%c0, %c0_1] : memref<16x32xf32, #tpu.memory_space<vmem>>, vector<16x32xf32>
    %c0_2 = arith.constant 0 : index
    %c0_3 = arith.constant 0 : index
    %4 = vector.load %arg3[%c0_2, %c0_3] : memref<16x32xf32, #tpu.memory_space<vmem>>, vector<16x32xf32>
    %c0_4 = arith.constant 0 : index
    %c0_5 = arith.constant 0 : index
    %5 = vector.load %arg4[%c0_4, %c0_5] : memref<32x32xf32, #tpu.memory_space<vmem>>, vector<32x32xf32>
    %cst = arith.constant dense<0.000000e+00> : vector<16x32xf32>
    %6 = tpu.matmul %4, %5, %cst {dimension_numbers = #tpu.dot_dimension_numbers<[1], [0], [0], [1], [0, 0, 1, 1], [], []>} : vector<16x32xf32>, vector<32x32xf32>, vector<16x32xf32> -> vector<16x32xf32>
    %7 = arith.addf %3, %6 : vector<16x32xf32>
    %c0_6 = arith.constant 0 : index
    %c0_7 = arith.constant 0 : index
    %8 = vector.load %arg6[%c0_6, %c0_7] : memref<16x32xf32, #tpu.memory_space<vmem>>, vector<16x32xf32>
    tpu.vector_store %arg6[%c0_6, %c0_7], %7 {strides = array<i32>} : memref<16x32xf32, #tpu.memory_space<vmem>>, vector<16x32xf32>,
    %c0_i32_8 = arith.constant 0 : i32
    %9 = arith.cmpi eq, %arg2, %c0_i32_8 : i32
    %10 = arith.extui %9 : i1 to i32
    %c0_i32_9 = arith.constant 0 : i32
    %11 = arith.cmpi ne, %10, %c0_i32_9 : i32
    scf.if %11 {
      %c0_10 = arith.constant 0 : index
      %c0_11 = arith.constant 0 : index
      %12 = vector.load %arg6[%c0_10, %c0_11] : memref<16x32xf32, #tpu.memory_space<vmem>>, vector<16x32xf32>
      %c0_12 = arith.constant 0 : index
      %c0_13 = arith.constant 0 : index
      %13 = vector.load %arg5[%c0_12, %c0_13] : memref<16x32xf32, #tpu.memory_space<vmem>>, vector<16x32xf32>
      tpu.vector_store %arg5[%c0_12, %c0_13], %12 {strides = array<i32>} : memref<16x32xf32, #tpu.memory_space<vmem>>, vector<16x32xf32>,
    } else {
    }
    return
  }
  func.func @transform_0(%arg0: i32, %arg1: i32, %arg2: i32) -> (i32, i32) {
    %c0_i32 = arith.constant 0 : i32
    return %arg0, %arg2 : i32, i32
  }
  func.func @transform_1(%arg0: i32, %arg1: i32, %arg2: i32) -> (i32, i32) {
    %c0_i32 = arith.constant 0 : i32
    return %arg2, %arg1 : i32, i32
  }
  func.func @transform_2(%arg0: i32, %arg1: i32, %arg2: i32) -> (i32, i32) {
    %c0_i32 = arith.constant 0 : i32
    return %arg0, %arg1 : i32, i32
  }
}

</mosaic_0001>

<bundles_post_ra>
// kernel: tpu_custom_call.1
= control target key start
LH: loop header
LB: loop body
LE: loop exit
PB: predicated region body
PF: predicated region fallthrough
CT: control target
= control target key end

     0   :  { %7 = vsyncpa [#allocation4], 0  ;;  %s345_s0 = inlined_call_operand.hbm [shape: f32[16,32], index: 0, kind: input, shape index: {}]   ;;  %s346_s1 = inlined_call_operand.hbm [shape: f32[32,32], index: 1, kind: input, shape index: {}]   ;;  %s347_s2 = inlined_call_operand.hbm [shape: f32[16,32], index: 2, kind: output, shape index: {}]  }
   0x1   :  { %8 = vsyncpa [#allocation7], 0 }
   0x2   :  { %9 = vsyncpa [#allocation5], 0  ;;  %s271_s9 = smov [#allocation3]   ;;  %s199_s13 = scalar_lea.hbm %s345_s0, 256 }
   0x3   :  { %s15_s10 = sshll.u32 %s271_s9, 4  ;;  %p200_p0 = scmp.ne.s32.totalorder %s345_s0, %s199_s13  ;;  %s16_s10 = int_to_ptr.vmem [resolvable:$true] %s15_s10 }
   0x4   :  { %p203_p1 = scmp.lt.u32.totalorder %s199_s13, %s345_s0 }
   0x6   :  { %p205_p2 = pnand %p203_p1, %p200_p0 }
   0x8   :  { %208 = shalt.err (!%p205_p2)
}
   0x9   :  { %s209_s18 = scalar_lea.vmem %s16_s10, 256  ;;  %p214_p4 = scmp.lt.s32.totalorder %s16_s10, %s16_s10 }
   0xa   :  { %p210_p3 = scmp.ne.s32.totalorder %s16_s10, %s209_s18  ;;  %p215_p5 = scmp.lt.s32.totalorder %s209_s18, %s209_s18 }
   0xc   :  { %p216_p6 = por %p215_p5, %p214_p4 }
   0xe   :  { %p217_p7 = pnand %p216_p6, %p210_p3 }
  0x10   :  { %220 = shalt.err (!%p217_p7)
}
  0x11   :  { %s272_s19 = smov 128   ;;  %s273_s20 = smov 8  }
  0x12   :  { %21 = dma.hbm_to_vmem [thread:$0]  %s345_s0, 256, %s16_s10, [#allocation4], %s272_s19, %s272_s19, %s273_s20  }
  0x13   :  { %s274_s23 = smov [#allocation6]   ;;  %s221_s27 = scalar_lea.hbm %s346_s1, 512 }
  0x14   :  { %s27_s24 = sshll.u32 %s274_s23, 4  ;;  %p222_p8 = scmp.ne.s32.totalorder %s346_s1, %s221_s27  ;;  %s28_s24 = int_to_ptr.vmem [resolvable:$true] %s27_s24 }
  0x15   :  { %p225_p9 = scmp.lt.u32.totalorder %s221_s27, %s346_s1 }
  0x17   :  { %p227_p10 = pnand %p225_p9, %p222_p8 }
  0x19   :  { %230 = shalt.err (!%p227_p10)
}
  0x1a   :  { %s231_s4 = scalar_lea.vmem %s28_s24, 512  ;;  %p236_p12 = scmp.lt.s32.totalorder %s28_s24, %s28_s24 }
  0x1b   :  { %p232_p11 = scmp.ne.s32.totalorder %s28_s24, %s231_s4  ;;  %p237_p13 = scmp.lt.s32.totalorder %s231_s4, %s231_s4 }
  0x1d   :  { %p238_p0 = por %p237_p13, %p236_p12 }
  0x1f   :  { %p239_p1 = pnand %p238_p0, %p232_p11 }
  0x21   :  { %242 = shalt.err (!%p239_p1)
}
  0x22   :  { %33 = dma.hbm_to_vmem [thread:$0]  %s346_s1, 512, %s28_s24, [#allocation7], %s272_s19, %s272_s19, %s273_s20  }
  0x23   :  { %265 = dma.done.wait [#allocation4], 256  }
  0x24   :  { %266 = vsyncadd [#allocation4], 4294967040 }
  0x25   :  { %267 = dma.done.wait [#allocation7], 512  }
  0x26   :  { %268 = vsyncadd [#allocation7], 4294966784  ;;  %vm44_vm0 = vcmask 261120   ;;  %v275_v0 = vmov 0.0   ;;  %v51_v1 = vld [vmem:[#allocation6] sm:$0xff]  ;;  %v52_v2 = vld [vmem:[#allocation6 + $0x8] sm:$0xff] }
  0x27   :  { %46 = vst.msk [vmem:[#allocation2 + $0x8] sm:$0xff] %vm44_vm0, %v275_v0  ;;  %45 = vst.msk [vmem:[#allocation2] sm:$0xff] %vm44_vm0, %v275_v0  ;;  %v53_v3 = vld [vmem:[#allocation6 + $0x10] sm:$0xff]  ;;  %v185_v4 = vpack.c.bf16 %v52_v2, %v51_v1  ;;  %v54_v5 = vld [vmem:[#allocation6 + $0x18] sm:$0xff]  ;;  %s276_s1 = smov [#allocation8]  }
  0x28   :  { %v49_v6 = vld [vmem:[#allocation3] sm:$0xff]  ;;  %v189_v7 = vpack.c.bf16 %v54_v5, %v53_v3  ;;  %v50_v8 = vld [vmem:[#allocation3 + $0x8] sm:$0xff]  ;;  %s153_s6 = sshll.u32 %s276_s1, 4  ;;  %s154_s6 = int_to_ptr.vmem [resolvable:$true] %s153_s6 }
  0x29   :  { %182 = vmatprep.mubr.msk.f32.mxu0 %vm44_vm0, %v49_v6  ;;  %186 = vmatprep.subr.bf16.mxu0 %v185_v4  ;;  %s243_s7 = scalar_lea.vmem %s154_s6, 256  ;;  %p248_p3 = scmp.lt.s32.totalorder %s154_s6, %s154_s6 }
  0x2a   :  { %188 = vmatpush3.bf16.msra.mxu0 %v185_v4  ;;  %p244_p2 = scmp.ne.s32.totalorder %s154_s6, %s243_s7  ;;  %p249_p4 = scmp.lt.s32.totalorder %s243_s7, %s243_s7 }
  0x2b   :  { %190 = vmatprep.subr.bf16.mxu0 %v189_v7 }
  0x2c   :  { %p250_p5 = por %p249_p4, %p248_p3 }
  0x2e   :  { %192 = vmatpush3.bf16.msra.mxu0 %v189_v7  ;;  %v48_v9 = vld [vmem:[#allocation2 + $0x8] sm:$0xff]  ;;  %v47_v10 = vld [vmem:[#allocation2] sm:$0xff]  ;;  %p251_p6 = pnand %p250_p5, %p244_p2 }
  0x31   :  { %183 = vmatmul.mubr.msk.f32.vlgmr.msra.gmra.mrb[0].mxu0 %vm44_vm0, %v50_v8 }
 0x104   :  { %v184_v11 = vpop.f32.mrb[0].mxu0 }
 0x105   :  { %v138_v12 = vadd.f32 %v184_v11, %v48_v9  ;;  %v128_v13 = vpop.f32.mrb[1].mxu0 }
 0x106   :  { %v137_v14 = vadd.f32 %v128_v13, %v47_v10 }
 0x107   :  { %140 = vst.msk [vmem:[#allocation2 + $0x8] sm:$0xff] %vm44_vm0, %v138_v12 }
 0x108   :  { %139 = vst.msk [vmem:[#allocation2] sm:$0xff] %vm44_vm0, %v137_v14 }
 0x10e   :  { %v145_v15 = vld [vmem:[#allocation2 + $0x8] sm:$0xff] }
 0x10f   :  { %v144_v16 = vld [vmem:[#allocation2] sm:$0xff]  ;;  %147 = vst.msk [vmem:[#allocation8 + $0x8] sm:$0xff] %vm44_vm0, %v145_v15 }
 0x110   :  { %146 = vst.msk [vmem:[#allocation8] sm:$0xff] %vm44_vm0, %v144_v16 }
 0x111   :  { %254 = shalt.err (!%p251_p6)
}
 0x112   :  { %s255_s10 = scalar_lea.hbm %s347_s2, 256 }
 0x113   :  { %p256_p7 = scmp.ne.s32.totalorder %s347_s2, %s255_s10  ;;  %p259_p8 = scmp.lt.u32.totalorder %s255_s10, %s347_s2 }
 0x115   :  { %p261_p9 = pnand %p259_p8, %p256_p7 }
 0x117   :  { %264 = shalt.err (!%p261_p9)
}
 0x118   :  { %159 = dma.vmem_to_hbm [thread:$0]  %s154_s6, 256, %s347_s2, [#allocation5], %s272_s19, %s272_s19, %s273_s20  }
 0x119   :  { %269 = dma.done.wait [#allocation5], 256  }
 0x11a   :  { %270 = vsyncadd [#allocation5], 4294967040 }
 0x11b   :  { %163 = vsyncpa [#allocation4], 1 }
 0x11c   :  { %164 = vsyncpa [#allocation7], 1 }
 0x11d   :  { %165 = vsyncpa [#allocation5], 1 }

</bundles_post_ra>
